<compile_context>
chip_gen: v7x
topology: tpu7x:2x2x1
jax: 0.10.0
libtpu: 0.0.40
codegen_flags: <defaults>
</compile_context>

<pallas_src>
import jax
import jax.numpy as jnp
from jax.experimental import pallas as pl
from jax.experimental.pallas import tpu as pltpu


def _copy_kernel(x_ref, o_ref):
    # Element-wise copy of the current VMEM tile.
    o_ref[...] = x_ref[...]


def _divisors(n):
    ds = []
    i = 1
    while i * i <= n:
        if n % i == 0:
            ds.append(i)
            ds.append(n // i)
        i += 1
    return ds


def _lane_dense_layout(N, itemsize, max_tile_bytes):
    """For N % 128 == 0: pick (R, C, tile_rows) with C a multiple-of-128 divisor."""
    packing = max(1, 4 // max(1, itemsize))   # f32:1, bf16:2, int8/fp8:4
    sub = 8 * packing                         # dtype-aware sublane multiple
    col_cap = max(128, (max_tile_bytes // (itemsize * sub)) // 128 * 128)

    C = 128                                   # 128 always divides N on this path
    for d in _divisors(N):
        if d % 128 == 0 and col_cap >= d > C:
            C = d
    R = N // C

    if R <= sub:
        # Single row stripe; full-extent block on the row axis is always legal.
        return R, C, R

    row_budget = max(sub, (max_tile_bytes // (C * itemsize)) // sub * sub)
    tr = min(row_budget, (R // sub) * sub)

    # v7x megacore: aim for >= 2 grid steps on the parallel axis for mid/large
    # arrays so both TensorCores stream (harmless on single-TC v5e/v6e).
    if N * itemsize > (2 << 20):
        half = max(sub, -(-((R + 1) // 2) // sub) * sub)
        tr = min(tr, half)

    return R, C, max(sub, tr)


def _fallback_layout(R, C, itemsize, max_tile_bytes):
    """Ragged shapes (size not a multiple of 128): (tr, tc) blocks, cdiv grid."""
    packing = max(1, 4 // max(1, itemsize))
    sub = 8 * packing

    if C < 128 or C * itemsize * sub <= max_tile_bytes:
        tc = C                                # full extent (legal regardless of 128)
    else:
        col_cap = max(128, (max_tile_bytes // (itemsize * sub)) // 128 * 128)
        tc = min((C // 128) * 128, col_cap)

    if R <= sub:
        tr = R                                # full extent on the row axis
    else:
        row_budget = max(sub, (max_tile_bytes // (tc * itemsize)) // sub * sub)
        tr = min(row_budget, (R // sub) * sub)

    return max(1, tr), max(1, tc)


def base_model_forward(x=None, *args, max_tile_bytes=8 * 1024 * 1024, **kwargs):
    """Identity forward for BaseModel (abstract module => passthrough)."""
    if x is None:
        # Mirror the abstract-base-class contract.
        raise NotImplementedError("BaseModel.forward is not implemented")

    x = jnp.asarray(x)
    if x.size == 0:
        return x

    orig_shape = x.shape
    N = x.size
    itemsize = x.dtype.itemsize

    if N % 128 == 0:
        # Lane-dense fast path: contiguous reshape, widest 128-multiple lanes.
        R, C, tr = _lane_dense_layout(N, itemsize, max_tile_bytes)
        x2 = x.reshape(R, C)
        grid = (pl.cdiv(R, tr),)
        in_specs = [pl.BlockSpec((tr, C), lambda i: (i, 0))]
        out_spec = pl.BlockSpec((tr, C), lambda i: (i, 0))
        dim_sem = ("parallel",)
    else:
        # Ragged fallback: keep the original trailing dim as lanes; boundary
        # blocks are masked by Pallas (no jnp.pad / slice passes).
        if x.ndim == 0:
            x2 = x.reshape(1, 1)
        elif x.ndim == 1:
            x2 = x.reshape(1, -1)
        else:
            x2 = x.reshape(-1, orig_shape[-1])
        R, C = x2.shape
        tr, tc = _fallback_layout(R, C, itemsize, max_tile_bytes)
        grid = (pl.cdiv(R, tr), pl.cdiv(C, tc))
        in_specs = [pl.BlockSpec((tr, tc), lambda i, j: (i, j))]
        out_spec = pl.BlockSpec((tr, tc), lambda i, j: (i, j))
        dim_sem = ("parallel", "parallel")

    out = pl.pallas_call(
        _copy_kernel,
        out_shape=jax.ShapeDtypeStruct(x2.shape, x2.dtype),
        grid_spec=pltpu.PrefetchScalarGridSpec(
            num_scalar_prefetch=0,
            grid=grid,
            in_specs=in_specs,
            out_specs=out_spec,
        ),
        compiler_params=pltpu.CompilerParams(
            dimension_semantics=dim_sem,
            vmem_limit_bytes=48 * 1024 * 1024,
        ),
    )(x2)

    return out.reshape(orig_shape)


if __name__ == "__main__":
    key = jax.random.PRNGKey(0)
    k1, k2, k3 = jax.random.split(key, 3)

    # Case 1: NCHW-style small input -> lane-dense (1, 2048) single block.
    x1 = jax.random.normal(k1, (2, 4, 16, 16), dtype=jnp.float32)
    y1 = jax.block_until_ready(base_model_forward(x1))
    assert y1.shape == x1.shape and y1.dtype == x1.dtype
    assert bool(jnp.array_equal(y1, x1))

    # Case 2: multi-step row-tiled grid under a tiny tile budget.
    x2 = jax.random.normal(k2, (512, 256), dtype=jnp.float32)
    y2 = jax.block_until_ready(base_model_forward(x2, max_tile_bytes=64 * 1024))
    assert y2.shape == x2.shape and bool(jnp.array_equal(y2, x2))

    # Case 3: ragged shape (size not a multiple of 128) -> full-extent fallback.
    x3 = jax.random.normal(k3, (3, 50), dtype=jnp.float32)
    y3 = jax.block_until_ready(base_model_forward(x3))
    assert y3.shape == x3.shape and bool(jnp.array_equal(y3, x3))

    # Case 4: bf16 to exercise dtype-aware sublane packing.
    x4 = jax.random.normal(k1, (8, 384), dtype=jnp.bfloat16)
    y4 = jax.block_until_ready(base_model_forward(x4))
    assert y4.shape == x4.shape and bool(jnp.array_equal(y4, x4))

    # Abstract-base-class contract: calling forward with no input raises.
    try:
        base_model_forward()
        raise AssertionError("expected NotImplementedError")
    except NotImplementedError:
        pass

    print("KERNEL_OK")
</pallas_src>

<mosaic_0001>
module attributes {stable_mosaic.version = 11 : i64} {
  func.func @_copy_kernel(%arg0: i32, %arg1: memref<1x2048xf32, #tpu.memory_space<vmem>>, %arg2: memref<1x2048xf32, #tpu.memory_space<vmem>>) attributes {dimension_semantics = [#tpu.dimension_semantics<parallel>], iteration_bounds = array<i64: 1>, scalar_prefetch = 0 : i64, scratch_operands = 0 : i64, tpu.core_type = #tpu.core_type<tc>, window_params = [{transform_indices = @transform_0, window_bounds = array<i64: 1, 2048>}, {transform_indices = @transform_1, window_bounds = array<i64: 1, 2048>}]} {
    %c0 = arith.constant 0 : index
    %c0_0 = arith.constant 0 : index
    %0 = vector.load %arg1[%c0, %c0_0] : memref<1x2048xf32, #tpu.memory_space<vmem>>, vector<1x2048xf32>
    %c0_1 = arith.constant 0 : index
    %c0_2 = arith.constant 0 : index
    %1 = vector.load %arg2[%c0_1, %c0_2] : memref<1x2048xf32, #tpu.memory_space<vmem>>, vector<1x2048xf32>
    tpu.vector_store %arg2[%c0_1, %c0_2], %0 {strides = array<i32>} : memref<1x2048xf32, #tpu.memory_space<vmem>>, vector<1x2048xf32>,
    return
  }
  func.func @transform_0(%arg0: i32) -> (i32, i32) {
    %c0_i32 = arith.constant 0 : i32
    %c0_i32_0 = arith.constant 0 : i32
    return %arg0, %c0_i32 : i32, i32
  }
  func.func @transform_1(%arg0: i32) -> (i32, i32) {
    %c0_i32 = arith.constant 0 : i32
    %c0_i32_0 = arith.constant 0 : i32
    return %arg0, %c0_i32 : i32, i32
  }
}

</mosaic_0001>

<bundles_post_ra>
// kernel: tpu_custom_call.1
= control target key start
LH: loop header
LB: loop body
LE: loop exit
PB: predicated region body
PF: predicated region fallthrough
CT: control target
= control target key end

     0   :  { %6 = vsyncpa [#allocation3], 0  ;;  %s126_s0 = inlined_call_operand.hbm [shape: f32[1,2048], index: 0, kind: input, shape index: {}]   ;;  %s127_s1 = inlined_call_operand.hbm [shape: f32[1,2048], index: 1, kind: output, shape index: {}]  }
   0x1   :  { %7 = vsyncpa [#allocation4], 0  ;;  %s90_s6 = smov [#allocation2]   ;;  %s42_s10 = scalar_lea.hbm %s126_s0, 256 }
   0x2   :  { %s14_s7 = sshll.u32 %s90_s6, 4  ;;  %p43_p0 = scmp.ne.s32.totalorder %s126_s0, %s42_s10  ;;  %s15_s7 = int_to_ptr.vmem [resolvable:$true] %s14_s7 }
   0x3   :  { %p46_p1 = scmp.lt.u32.totalorder %s42_s10, %s126_s0 }
   0x5   :  { %p48_p2 = pnand %p46_p1, %p43_p0 }
   0x7   :  { %51 = shalt.err (!%p48_p2)
}
   0x8   :  { %s52_s15 = scalar_lea.vmem %s15_s7, 256  ;;  %p57_p4 = scmp.lt.s32.totalorder %s15_s7, %s15_s7 }
   0x9   :  { %p53_p3 = scmp.ne.s32.totalorder %s15_s7, %s52_s15  ;;  %p58_p5 = scmp.lt.s32.totalorder %s52_s15, %s52_s15 }
   0xb   :  { %p59_p6 = por %p58_p5, %p57_p4 }
   0xd   :  { %p60_p7 = pnand %p59_p6, %p53_p3 }
   0xf   :  { %63 = shalt.err (!%p60_p7)
}
  0x10   :  { %17 = dma.hbm_to_vmem [thread:$0]  %s126_s0, 256, %s15_s7, [#allocation3]  }
  0x11   :  { %86 = dma.done.wait [#allocation3], 256  }
  0x12   :  { %87 = vsyncadd [#allocation3], 4294967040  ;;  %s91_s18 = smov [#allocation5]   ;;  %v21_v0 = vld [vmem:[#allocation2] sm:$0xff]  ;;  %v22_v1 = vld [vmem:[#allocation2 + $0x8] sm:$0xff] }
  0x13   :  { %s31_s19 = sshll.u32 %s91_s18, 4  ;;  %23 = vst [vmem:[#allocation5] sm:$0xff] %v21_v0  ;;  %24 = vst [vmem:[#allocation5 + $0x8] sm:$0xff] %v22_v1  ;;  %s32_s19 = int_to_ptr.vmem [resolvable:$true] %s31_s19 }
  0x14   :  { %s64_s20 = scalar_lea.vmem %s32_s19, 256  ;;  %p69_p9 = scmp.lt.s32.totalorder %s32_s19, %s32_s19 }
  0x15   :  { %p65_p8 = scmp.ne.s32.totalorder %s32_s19, %s64_s20  ;;  %p70_p10 = scmp.lt.s32.totalorder %s64_s20, %s64_s20 }
  0x17   :  { %p71_p11 = por %p70_p10, %p69_p9 }
  0x19   :  { %p72_p12 = pnand %p71_p11, %p65_p8 }
  0x1b   :  { %75 = shalt.err (!%p72_p12)
}
  0x1c   :  { %s76_s0 = scalar_lea.hbm %s127_s1, 256 }
  0x1d   :  { %p77_p13 = scmp.ne.s32.totalorder %s127_s1, %s76_s0  ;;  %p80_p0 = scmp.lt.u32.totalorder %s76_s0, %s127_s1 }
  0x1f   :  { %p82_p1 = pnand %p80_p0, %p77_p13 }
  0x21   :  { %85 = shalt.err (!%p82_p1)
}
  0x22   :  { %34 = dma.vmem_to_hbm [thread:$0]  %s32_s19, 256, %s127_s1, [#allocation4]  }
  0x23   :  { %88 = dma.done.wait [#allocation4], 256  }
  0x24   :  { %89 = vsyncadd [#allocation4], 4294967040 }
  0x25   :  { %38 = vsyncpa [#allocation3], 1 }
  0x26   :  { %39 = vsyncpa [#allocation4], 1 }

</bundles_post_ra>
